<compile_context>
chip_gen: v5e
topology: v5e:2x2
jax: 0.10.0
libtpu: 0.0.40
codegen_flags: <defaults>
</compile_context>

<pallas_src>
import jax
import jax.numpy as jnp
from jax.experimental import pallas as pl
from jax.experimental.pallas import tpu as pltpu

NFEATURES = 2
NFEATURES_OUT = 2
NBLOCKS = 3
NUNITS = 64
NPAD = 128                   # lane-padded hidden width (zero padding)
NCOLS_IN = NFEATURES + 2     # [x0, x1, t, 1/std(t)]
SIGMA = 25.0                 # marginal_prob_std(t) = sqrt((sigma^(2t) - 1) / (2 ln sigma))
DEFAULT_TILE_B = 2048


def _round_up(x, m):
  return ((x + m - 1) // m) * m


def _score_mlp_kernel(xin_ref, w_fin_ref, b_fin_ref, w_mid_ref, b_mid_ref,
                      w_out_ref, b_out_ref, o_ref):
  # xin_ref: (TILE_B, 4) f32 = hstack([x, t, 1/marginal_prob_std(t)])
  xin = xin_ref[...]
  tb = xin.shape[0]

  # Fused inblock + midblock[0] linear (no ReLU between them in the module):
  #   h = relu(x_in @ (W_in @ W_mid0) + (b_in @ W_mid0 + b_mid0))
  # K = 3, so this is 3 VPU broadcast-FMAs instead of a padded MXU matmul.
  h = jnp.broadcast_to(b_fin_ref[...], (tb, NPAD))
  for k in range(NFEATURES + 1):                        # static unroll
    h = h + xin[:, k:k + 1] * w_fin_ref[k:k + 1, :]
  h = jnp.maximum(h, 0.0)                               # midblock[0] ReLU

  # Remaining mid blocks: bf16 MXU matmuls, f32 accumulation, f32 bias add + ReLU.
  for i in range(NBLOCKS - 1):
    h = jnp.dot(h.astype(jnp.bfloat16), w_mid_ref[i],
                preferred_element_type=jnp.float32) + b_mid_ref[i]
    h = jnp.maximum(h, 0.0)

  # outblock: Linear(64 -> 2), zero-padded to 128 output lanes for the MXU pass.
  out = jnp.dot(h.astype(jnp.bfloat16), w_out_ref[...],
                preferred_element_type=jnp.float32) + b_out_ref[...]

  # Divide by marginal_prob_std(t); inv_std precomputed (expm1-accurate) in wrapper.
  inv_std = xin[:, NFEATURES + 1:NFEATURES + 2]         # (TILE_B, 1)
  # Narrow store: only the real output columns go back to HBM (masked vst).
  o_ref[...] = out[:, :NFEATURES_OUT] * inv_std


def _pad_params(params):
  """Fold inblock into midblock[0] and zero-pad to the lane-dense 128-wide layout.

  MXU weights are returned in bf16 (f32 accumulation in-kernel); FMA weights and
  all biases stay f32 (VPU work stays f32).
  """
  w_in, b_in, w_mid, b_mid, w_out, b_out = params
  # Re-association only (f32): relu is the first nonlinearity after these two linears.
  w_fused = w_in @ w_mid[0]                             # (3, 64)
  b_fused = b_in @ w_mid[0] + b_mid[0]                  # (1, 64)

  wp_fin = jnp.zeros((NFEATURES + 1, NPAD), jnp.float32).at[:, :NUNITS].set(w_fused)
  bp_fin = jnp.zeros((1, NPAD), jnp.float32).at[:, :NUNITS].set(b_fused)
  wp_mid = jnp.zeros((NBLOCKS - 1, NPAD, NPAD), jnp.float32
                     ).at[:, :NUNITS, :NUNITS].set(w_mid[1:])
  bp_mid = jnp.zeros((NBLOCKS - 1, 1, NPAD), jnp.float32
                     ).at[:, :, :NUNITS].set(b_mid[1:])
  wp_out = jnp.zeros((NPAD, NPAD), jnp.float32).at[:NUNITS, :NFEATURES_OUT].set(w_out)
  bp_out = jnp.zeros((1, NPAD), jnp.float32).at[:, :NFEATURES_OUT].set(b_out)
  return (wp_fin, bp_fin,
          wp_mid.astype(jnp.bfloat16), bp_mid,
          wp_out.astype(jnp.bfloat16), bp_out)


def score_model_mlp(x, t, params, tile_b=DEFAULT_TILE_B):
  """x: (B, NFEATURES) f32, t: (B,) f32 -> (B, NFEATURES_OUT) f32."""
  B = x.shape[0]
  # Tile selection: multiple of 8, and capped so the grid has >= 2 steps whenever
  # possible (lets dimension_semantics=("parallel",) use both v7x TensorCores).
  tb = _round_up(max(min(tile_b, (B + 1) // 2), 1), 8)
  Bp = _round_up(B, tb)

  # hstack glue + accurate 1/std(t) (expm1 keeps precision for small t); computed
  # once per row in XLA, fused with the concatenate.  Kernel keeps the multiply.
  log_sigma = jnp.log(jnp.float32(SIGMA))
  t32 = t.astype(jnp.float32)
  inv_std = jax.lax.rsqrt(jnp.expm1(2.0 * t32 * log_sigma) / (2.0 * log_sigma))
  xin = jnp.concatenate(
      [x.astype(jnp.float32), t32[:, None], inv_std[:, None]], axis=-1)
  if Bp != B:
    # Zero padding rows: inv_std = 0 -> padded outputs are exactly 0 (no inf/nan).
    xin = jnp.pad(xin, ((0, Bp - B), (0, 0)))

  weights = _pad_params(params)
  grid = (Bp // tb,)

  flops = 2 * Bp * ((NFEATURES + 1) * NPAD
                    + (NBLOCKS - 1) * NPAD * NPAD
                    + NPAD * NPAD)
  weight_bytes = sum(int(a.size) * a.dtype.itemsize for a in weights)
  bytes_accessed = (Bp * NCOLS_IN * 4            # xin read
                    + Bp * NFEATURES_OUT * 4     # narrow output write
                    + weight_bytes)

  out = pl.pallas_call(
      _score_mlp_kernel,
      out_shape=jax.ShapeDtypeStruct((Bp, NFEATURES_OUT), jnp.float32),
      grid_spec=pltpu.PrefetchScalarGridSpec(
          num_scalar_prefetch=0,
          grid=grid,
          in_specs=[
              # batch-tiled input (last dim == full array dim)
              pl.BlockSpec((tb, NCOLS_IN), lambda i: (i, 0)),
              # weights/biases: constant block index -> DMA'd once, VMEM-resident
              pl.BlockSpec((NFEATURES + 1, NPAD), lambda i: (0, 0)),
              pl.BlockSpec((1, NPAD), lambda i: (0, 0)),
              pl.BlockSpec((NBLOCKS - 1, NPAD, NPAD), lambda i: (0, 0, 0)),
              pl.BlockSpec((NBLOCKS - 1, 1, NPAD), lambda i: (0, 0, 0)),
              pl.BlockSpec((NPAD, NPAD), lambda i: (0, 0)),
              pl.BlockSpec((1, NPAD), lambda i: (0, 0)),
          ],
          # Narrow, real-width output (last dim == full array dim): no padded
          # HBM writeback and no wrapper column re-slice.
          out_specs=pl.BlockSpec((tb, NFEATURES_OUT), lambda i: (i, 0)),
      ),
      compiler_params=pltpu.CompilerParams(
          dimension_semantics=("parallel",),
          vmem_limit_bytes=32 * 1024 * 1024),
      cost_estimate=pl.CostEstimate(
          flops=flops, transcendentals=0, bytes_accessed=bytes_accessed),
  )(xin, *weights)

  return out[:B] if Bp != B else out


def init_params(key):
  """Deterministic parameter init matching the PyTorch module's shapes.

  PyTorch nn.Linear(in, out) has weight (out, in); we store the transpose
  (in, out) so the forward computes x @ W + b.  Biases are kept 2D (1, out).
  """
  ks = jax.random.split(key, 2 + 2 * NBLOCKS + 2)
  i = iter(range(len(ks)))

  def lin(kw, kb, fan_in, fan_out):
    bound = 1.0 / jnp.sqrt(jnp.float32(fan_in))
    w = jax.random.uniform(kw, (fan_in, fan_out), jnp.float32, -bound, bound)
    b = jax.random.uniform(kb, (1, fan_out), jnp.float32, -bound, bound)
    return w, b

  w_in, b_in = lin(ks[next(i)], ks[next(i)], NFEATURES + 1, NUNITS)

  w_mid_list, b_mid_list = [], []
  for _ in range(NBLOCKS):
    w, b = lin(ks[next(i)], ks[next(i)], NUNITS, NUNITS)
    w_mid_list.append(w)
    b_mid_list.append(b)
  w_mid = jnp.stack(w_mid_list, axis=0)          # (NBLOCKS, NUNITS, NUNITS)
  b_mid = jnp.stack(b_mid_list, axis=0)          # (NBLOCKS, 1, NUNITS)

  w_out, b_out = lin(ks[next(i)], ks[next(i)], NUNITS, NFEATURES_OUT)
  return (w_in, b_in, w_mid, b_mid, w_out, b_out)


def _reference(x, t, params):
  """Pure-JAX f32 reference of the same forward pass (unpadded, unfused weights)."""
  w_in, b_in, w_mid, b_mid, w_out, b_out = params
  val = jnp.concatenate([x, t[:, None]], axis=-1)
  val = val @ w_in + b_in
  for i in range(NBLOCKS):
    val = jnp.maximum(val @ w_mid[i] + b_mid[i], 0.0)
  out = val @ w_out + b_out
  log_sigma = jnp.log(jnp.float32(SIGMA))
  std = jnp.sqrt(jnp.expm1(2.0 * t * log_sigma) / (2.0 * log_sigma))
  return out / std[:, None]


if __name__ == "__main__":
  key = jax.random.PRNGKey(0)
  k_p, k_x1, k_t1, k_x2, k_t2 = jax.random.split(key, 5)
  params = init_params(k_p)

  # bf16 MXU operands (f32 accumulation) loosen the accuracy budget vs. the f32
  # reference to the ~1e-2 relative range; 5e-2 gives headroom for worst-case rows.
  TOL = 5e-2

  # Small single-tile case.
  B1 = 8
  x1 = jax.random.normal(k_x1, (B1, NFEATURES), jnp.float32)
  t1 = jax.random.uniform(k_t1, (B1,), jnp.float32, 0.05, 1.0)
  out1 = jax.block_until_ready(score_model_mlp(x1, t1, params))
  ref1 = _reference(x1, t1, params)
  assert out1.shape == (B1, NFEATURES_OUT)
  assert jnp.allclose(out1, ref1, atol=TOL, rtol=TOL)

  # Multi-tile case with batch padding (exercises the grid + parallel axis).
  B2 = 200
  x2 = jax.random.normal(k_x2, (B2, NFEATURES), jnp.float32)
  t2 = jax.random.uniform(k_t2, (B2,), jnp.float32, 0.05, 1.0)
  out2 = jax.block_until_ready(score_model_mlp(x2, t2, params, tile_b=64))
  ref2 = _reference(x2, t2, params)
  assert out2.shape == (B2, NFEATURES_OUT)
  assert jnp.allclose(out2, ref2, atol=TOL, rtol=TOL)

  print("KERNEL_OK")
</pallas_src>

<mosaic_0001>
module attributes {stable_mosaic.version = 11 : i64} {
  func.func @_score_mlp_kernel(%arg0: i32, %arg1: memref<8x4xf32, #tpu.memory_space<vmem>>, %arg2: memref<3x128xf32, #tpu.memory_space<vmem>>, %arg3: memref<1x128xf32, #tpu.memory_space<vmem>>, %arg4: memref<2x128x128xbf16, #tpu.memory_space<vmem>>, %arg5: memref<2x1x128xf32, #tpu.memory_space<vmem>>, %arg6: memref<128x128xbf16, #tpu.memory_space<vmem>>, %arg7: memref<1x128xf32, #tpu.memory_space<vmem>>, %arg8: memref<8x2xf32, #tpu.memory_space<vmem>>) attributes {dimension_semantics = [#tpu.dimension_semantics<parallel>], iteration_bounds = array<i64: 1>, scalar_prefetch = 0 : i64, scratch_operands = 0 : i64, tpu.core_type = #tpu.core_type<tc>, window_params = [{transform_indices = @transform_0, window_bounds = array<i64: 8, 4>}, {pipeline_mode = #tpu.pipeline_mode<synchronous>, transform_indices = @transform_1, window_bounds = array<i64: 3, 128>}, {pipeline_mode = #tpu.pipeline_mode<synchronous>, transform_indices = @transform_2, window_bounds = array<i64: 1, 128>}, {pipeline_mode = #tpu.pipeline_mode<synchronous>, transform_indices = @transform_3, window_bounds = array<i64: 2, 128, 128>}, {pipeline_mode = #tpu.pipeline_mode<synchronous>, transform_indices = @transform_4, window_bounds = array<i64: 2, 1, 128>}, {pipeline_mode = #tpu.pipeline_mode<synchronous>, transform_indices = @transform_5, window_bounds = array<i64: 128, 128>}, {pipeline_mode = #tpu.pipeline_mode<synchronous>, transform_indices = @transform_6, window_bounds = array<i64: 1, 128>}, {transform_indices = @transform_7, window_bounds = array<i64: 8, 2>}]} {
    %c0 = arith.constant 0 : index
    %c0_0 = arith.constant 0 : index
    %0 = vector.load %arg1[%c0, %c0_0] : memref<8x4xf32, #tpu.memory_space<vmem>>, vector<8x4xf32>
    %c0_1 = arith.constant 0 : index
    %c0_2 = arith.constant 0 : index
    %1 = vector.load %arg3[%c0_1, %c0_2] : memref<1x128xf32, #tpu.memory_space<vmem>>, vector<1x128xf32>
    %2 = vector.shape_cast %1 : vector<1x128xf32> to vector<1x128xf32>
    %3 = vector.broadcast %2 : vector<1x128xf32> to vector<8x128xf32>
    %4 = vector.extract_strided_slice %0 {offsets = [0, 0], sizes = [8, 1], strides = [1, 1]} : vector<8x4xf32> to vector<8x1xf32>
    %c0_3 = arith.constant 0 : index
    %c0_4 = arith.constant 0 : index
    %5 = vector.load %arg2[%c0_3, %c0_4] : memref<3x128xf32, #tpu.memory_space<vmem>>, vector<1x128xf32>
    %6 = vector.broadcast %4 : vector<8x1xf32> to vector<8x128xf32>
    %7 = vector.broadcast %5 : vector<1x128xf32> to vector<8x128xf32>
    %8 = arith.mulf %6, %7 : vector<8x128xf32>
    %9 = arith.addf %3, %8 : vector<8x128xf32>
    %10 = vector.extract_strided_slice %0 {offsets = [0, 1], sizes = [8, 1], strides = [1, 1]} : vector<8x4xf32> to vector<8x1xf32>
    %c1 = arith.constant 1 : index
    %c0_5 = arith.constant 0 : index
    %11 = vector.load %arg2[%c1, %c0_5] : memref<3x128xf32, #tpu.memory_space<vmem>>, vector<1x128xf32>
    %12 = vector.broadcast %10 : vector<8x1xf32> to vector<8x128xf32>
    %13 = vector.broadcast %11 : vector<1x128xf32> to vector<8x128xf32>
    %14 = arith.mulf %12, %13 : vector<8x128xf32>
    %15 = arith.addf %9, %14 : vector<8x128xf32>
    %16 = vector.extract_strided_slice %0 {offsets = [0, 2], sizes = [8, 1], strides = [1, 1]} : vector<8x4xf32> to vector<8x1xf32>
    %c2 = arith.constant 2 : index
    %c0_6 = arith.constant 0 : index
    %17 = vector.load %arg2[%c2, %c0_6] : memref<3x128xf32, #tpu.memory_space<vmem>>, vector<1x128xf32>
    %18 = vector.broadcast %16 : vector<8x1xf32> to vector<8x128xf32>
    %19 = vector.broadcast %17 : vector<1x128xf32> to vector<8x128xf32>
    %20 = arith.mulf %18, %19 : vector<8x128xf32>
    %21 = arith.addf %15, %20 : vector<8x128xf32>
    %cst = arith.constant 0.000000e+00 : f32
    %22 = vector.broadcast %cst : f32 to vector<8x128xf32>
    %23 = arith.maximumf %21, %22 : vector<8x128xf32>
    %24 = arith.truncf %23 : vector<8x128xf32> to vector<8x128xbf16>
    %c0_7 = arith.constant 0 : index
    %c0_8 = arith.constant 0 : index
    %c0_9 = arith.constant 0 : index
    %25 = vector.load %arg4[%c0_7, %c0_8, %c0_9] : memref<2x128x128xbf16, #tpu.memory_space<vmem>>, vector<1x128x128xbf16>
    %26 = vector.shape_cast %25 : vector<1x128x128xbf16> to vector<128x128xbf16>
    %cst_10 = arith.constant dense<0.000000e+00> : vector<8x128xf32>
    %27 = tpu.matmul %24, %26, %cst_10 {dimension_numbers = #tpu.dot_dimension_numbers<[1], [0], [0], [1], [0, 0, 1, 1], [], []>} : vector<8x128xbf16>, vector<128x128xbf16>, vector<8x128xf32> -> vector<8x128xf32>
    %c0_11 = arith.constant 0 : index
    %c0_12 = arith.constant 0 : index
    %c0_13 = arith.constant 0 : index
    %28 = vector.load %arg5[%c0_11, %c0_12, %c0_13] : memref<2x1x128xf32, #tpu.memory_space<vmem>>, vector<1x1x128xf32>
    %29 = vector.shape_cast %28 : vector<1x1x128xf32> to vector<1x128xf32>
    %30 = vector.broadcast %29 : vector<1x128xf32> to vector<8x128xf32>
    %31 = arith.addf %27, %30 : vector<8x128xf32>
    %cst_14 = arith.constant 0.000000e+00 : f32
    %32 = vector.broadcast %cst_14 : f32 to vector<8x128xf32>
    %33 = arith.maximumf %31, %32 : vector<8x128xf32>
    %34 = arith.truncf %33 : vector<8x128xf32> to vector<8x128xbf16>
    %c1_15 = arith.constant 1 : index
    %c0_16 = arith.constant 0 : index
    %c0_17 = arith.constant 0 : index
    %35 = vector.load %arg4[%c1_15, %c0_16, %c0_17] : memref<2x128x128xbf16, #tpu.memory_space<vmem>>, vector<1x128x128xbf16>
    %36 = vector.shape_cast %35 : vector<1x128x128xbf16> to vector<128x128xbf16>
    %cst_18 = arith.constant dense<0.000000e+00> : vector<8x128xf32>
    %37 = tpu.matmul %34, %36, %cst_18 {dimension_numbers = #tpu.dot_dimension_numbers<[1], [0], [0], [1], [0, 0, 1, 1], [], []>} : vector<8x128xbf16>, vector<128x128xbf16>, vector<8x128xf32> -> vector<8x128xf32>
    %c1_19 = arith.constant 1 : index
    %c0_20 = arith.constant 0 : index
    %c0_21 = arith.constant 0 : index
    %38 = vector.load %arg5[%c1_19, %c0_20, %c0_21] : memref<2x1x128xf32, #tpu.memory_space<vmem>>, vector<1x1x128xf32>
    %39 = vector.shape_cast %38 : vector<1x1x128xf32> to vector<1x128xf32>
    %40 = vector.broadcast %39 : vector<1x128xf32> to vector<8x128xf32>
    %41 = arith.addf %37, %40 : vector<8x128xf32>
    %cst_22 = arith.constant 0.000000e+00 : f32
    %42 = vector.broadcast %cst_22 : f32 to vector<8x128xf32>
    %43 = arith.maximumf %41, %42 : vector<8x128xf32>
    %44 = arith.truncf %43 : vector<8x128xf32> to vector<8x128xbf16>
    %c0_23 = arith.constant 0 : index
    %c0_24 = arith.constant 0 : index
    %45 = vector.load %arg6[%c0_23, %c0_24] : memref<128x128xbf16, #tpu.memory_space<vmem>>, vector<128x128xbf16>
    %cst_25 = arith.constant dense<0.000000e+00> : vector<8x128xf32>
    %46 = tpu.matmul %44, %45, %cst_25 {dimension_numbers = #tpu.dot_dimension_numbers<[1], [0], [0], [1], [0, 0, 1, 1], [], []>} : vector<8x128xbf16>, vector<128x128xbf16>, vector<8x128xf32> -> vector<8x128xf32>
    %c0_26 = arith.constant 0 : index
    %c0_27 = arith.constant 0 : index
    %47 = vector.load %arg7[%c0_26, %c0_27] : memref<1x128xf32, #tpu.memory_space<vmem>>, vector<1x128xf32>
    %48 = vector.broadcast %47 : vector<1x128xf32> to vector<8x128xf32>
    %49 = arith.addf %46, %48 : vector<8x128xf32>
    %50 = vector.extract_strided_slice %0 {offsets = [0, 3], sizes = [8, 1], strides = [1, 1]} : vector<8x4xf32> to vector<8x1xf32>
    %51 = vector.extract_strided_slice %49 {offsets = [0, 0], sizes = [8, 2], strides = [1, 1]} : vector<8x128xf32> to vector<8x2xf32>
    %52 = vector.broadcast %50 : vector<8x1xf32> to vector<8x2xf32>
    %53 = arith.mulf %51, %52 : vector<8x2xf32>
    %c0_28 = arith.constant 0 : index
    %c0_29 = arith.constant 0 : index
    %54 = vector.load %arg8[%c0_28, %c0_29] : memref<8x2xf32, #tpu.memory_space<vmem>>, vector<8x2xf32>
    tpu.vector_store %arg8[%c0_28, %c0_29], %53 {strides = array<i32>} : memref<8x2xf32, #tpu.memory_space<vmem>>, vector<8x2xf32>,
    return
  }
  func.func @transform_0(%arg0: i32) -> (i32, i32) {
    %c0_i32 = arith.constant 0 : i32
    %c0_i32_0 = arith.constant 0 : i32
    return %arg0, %c0_i32 : i32, i32
  }
  func.func @transform_1(%arg0: i32) -> (i32, i32) {
    %c0_i32 = arith.constant 0 : i32
    %c0_i32_0 = arith.constant 0 : i32
    %c0_i32_1 = arith.constant 0 : i32
    return %c0_i32, %c0_i32_0 : i32, i32
  }
  func.func @transform_2(%arg0: i32) -> (i32, i32) {
    %c0_i32 = arith.constant 0 : i32
    %c0_i32_0 = arith.constant 0 : i32
    %c0_i32_1 = arith.constant 0 : i32
    return %c0_i32, %c0_i32_0 : i32, i32
  }
  func.func @transform_3(%arg0: i32) -> (i32, i32, i32) {
    %c0_i32 = arith.constant 0 : i32
    %c0_i32_0 = arith.constant 0 : i32
    %c0_i32_1 = arith.constant 0 : i32
    %c0_i32_2 = arith.constant 0 : i32
    return %c0_i32, %c0_i32_0, %c0_i32_1 : i32, i32, i32
  }
  func.func @transform_4(%arg0: i32) -> (i32, i32, i32) {
    %c0_i32 = arith.constant 0 : i32
    %c0_i32_0 = arith.constant 0 : i32
    %c0_i32_1 = arith.constant 0 : i32
    %c0_i32_2 = arith.constant 0 : i32
    return %c0_i32, %c0_i32_0, %c0_i32_1 : i32, i32, i32
  }
  func.func @transform_5(%arg0: i32) -> (i32, i32) {
    %c0_i32 = arith.constant 0 : i32
    %c0_i32_0 = arith.constant 0 : i32
    %c0_i32_1 = arith.constant 0 : i32
    return %c0_i32, %c0_i32_0 : i32, i32
  }
  func.func @transform_6(%arg0: i32) -> (i32, i32) {
    %c0_i32 = arith.constant 0 : i32
    %c0_i32_0 = arith.constant 0 : i32
    %c0_i32_1 = arith.constant 0 : i32
    return %c0_i32, %c0_i32_0 : i32, i32
  }
  func.func @transform_7(%arg0: i32) -> (i32, i32) {
    %c0_i32 = arith.constant 0 : i32
    %c0_i32_0 = arith.constant 0 : i32
    return %arg0, %c0_i32 : i32, i32
  }
}

</mosaic_0001>

<bundles_post_ra>
// kernel: tpu_custom_call.1
= control target key start
LH: loop header
LB: loop body
LE: loop exit
PB: predicated region body
PF: predicated region fallthrough
CT: control target
= control target key end

     0   :  { %12 = vsyncpa [#allocation3], 0  ;;  %s632_s0 = inlined_call_operand.vmem [shape: f32[8,4], index: 0, kind: input, shape index: {}]   ;;  %s633_s1 = inlined_call_operand.vmem [shape: f32[3,128], index: 1, kind: input, shape index: {}]   ;;  %s634_s2 = inlined_call_operand.vmem [shape: f32[1,128], index: 2, kind: input, shape index: {}]   ;;  %s635_s3 = inlined_call_operand.hbm [shape: bf16[2,128,128], index: 3, kind: input, shape index: {}]   ;;  %s636_s4 = inlined_call_operand.vmem [shape: f32[2,1,128], index: 4, kind: input, shape index: {}]   ;;  %s637_s5 = inlined_call_operand.hbm [shape: bf16[128,128], index: 5, kind: input, shape index: {}]   ;;  %s638_s6 = inlined_call_operand.vmem [shape: f32[1,128], index: 6, kind: input, shape index: {}]   ;;  %s639_s7 = inlined_call_operand.vmem [shape: f32[8,2], index: 7, kind: output, shape index: {}]  }
   0x1   :  { %s24_s26 = sshll.u32 %s635_s3, 4  ;;  %s25_s26 = int_to_ptr.hbm [resolvable:$true] %s24_s26 }
   0x2   :  { %13 = vsyncpa [#allocation5], 0  ;;  %s545_s27 = smov [#allocation2]   ;;  %s39_s8 = sshll.u32 %s637_s5, 4  ;;  %s40_s8 = int_to_ptr.hbm [resolvable:$true] %s39_s8 }
   0x3   :  { %s26_s28 = sshll.u32 %s545_s27, 4  ;;  %s546_s9 = smov 64   ;;  %s27_s28 = int_to_ptr.vmem [resolvable:$true] %s26_s28 }
   0x4   :  { %s547_s10 = smov 4   ;;  %s548_s11 = smov [#allocation4]  }
   0x5   :  { %32 = dma.hbm_to_vmem [thread:$0]  %s25_s26, 2048, %s27_s28, [#allocation3], %s546_s9, %s546_s9, %s547_s10  }
   0x6   :  { %s41_s12 = sshll.u32 %s548_s11, 4  ;;  %s42_s12 = int_to_ptr.vmem [resolvable:$true] %s41_s12 }
   0x7   :  { %47 = dma.hbm_to_vmem [thread:$0]  %s40_s8, 1024, %s42_s12, [#allocation5], %s546_s9, %s546_s9, %s547_s10  }
   0x8   :  { %541 = dma.done.wait [#allocation3], 2048  }
   0x9   :  { %542 = vsyncadd [#allocation3], 4294965248 }
   0xa   :  { %543 = dma.done.wait [#allocation5], 1024  }
   0xb   :  { %544 = vsyncadd [#allocation5], 4294966272  ;;  %v549_v0 = vmov 0   ;;  %v550_v1 = vmov 2   ;;  %v602_v2 = vld [vmem:[%s632_s0] sm:$0xff]  ;;  %v456_v3 = vld [vmem:[#allocation2 + $0x38] sm:$0xff] }
   0xc   :  { %481 = vset.pattern.permute.xlu0 %v549_v0  ;;  %483 = vset.pattern.permute.xlu1 %v550_v1  ;;  %v455_v4 = vld [vmem:[#allocation2 + $0x30] sm:$0xff]  ;;  %v454_v5 = vld [vmem:[#allocation2 + $0x28] sm:$0xff]  ;;  %v551_v6 = vmov 1   ;;  %v453_v7 = vld [vmem:[#allocation2 + $0x20] sm:$0xff]  ;;  %v552_v49 = vmov 3   ;;  %vm344_vm0 = vcmask 15360  }
   0xd   :  { %66 = vperm.xlu0 %481, %v602_v2   ;;  %82 = vperm.xlu1 %483, %v602_v2   ;;  %v452_v8 = vld [vmem:[#allocation2 + $0x18] sm:$0xff]  ;;  %v451_v9 = vld [vmem:[#allocation2 + $0x10] sm:$0xff]  ;;  %v450_v10 = vld [vmem:[#allocation2 + $0x8] sm:$0xff] }
   0xe   :  { %158 = vmatpush.bf16.msra.mxu0 %v456_v3  ;;  %v449_v11 = vld [vmem:[#allocation2] sm:$0xff]  ;;  %v464_v12 = vld [vmem:[#allocation2 + $0x78] sm:$0xff]  ;;  %v463_v13 = vld [vmem:[#allocation2 + $0x70] sm:$0xff] }
   0xf   :  { %243 = vmatpush.bf16.msra.mxu1 %v464_v12  ;;  %v462_v14 = vld [vmem:[#allocation2 + $0x68] sm:$0xff]  ;;  %v461_v15 = vld [vmem:[#allocation2 + $0x60] sm:$0xff]  ;;  %v460_v18 = vld [vmem:[#allocation2 + $0x58] sm:$0xff] }
  0x10   :  { %v487_v17 = vld [vmem:[%s633_s1] ss:$0 sm:$0xff]  ;;  %v488_v21 = vld [vmem:[%s633_s1 + $0x1] ss:$0 sm:$0xff]  ;;  %v489_v22 = vld [vmem:[%s633_s1 + $0x2] ss:$0 sm:$0xff] }
  0x11   :  { %v486_v19 = vld [vmem:[%s634_s2] ss:$0 sm:$0xff]  ;;  %v459_v23 = vld [vmem:[#allocation2 + $0x50] sm:$0xff]  ;;  %v458_v33 = vld [vmem:[#allocation2 + $0x48] sm:$0xff] }
  0x12   :  { %159 = vmatpush.bf16.msra.mxu0 %v455_v4  ;;  %v457_v34 = vld [vmem:[#allocation2 + $0x40] sm:$0xff]  ;;  %v472_v35 = vld [vmem:[#allocation4 + $0x38] sm:$0xff]  ;;  %v471_v36 = vld [vmem:[#allocation4 + $0x30] sm:$0xff] }
  0x13   :  { %244 = vmatpush.bf16.msra.mxu1 %v463_v13  ;;  %326 = vmatpush.bf16.msra.mxu2 %v472_v35  ;;  %v470_v37 = vld [vmem:[#allocation4 + $0x28] sm:$0xff]  ;;  %v469_v38 = vld [vmem:[#allocation4 + $0x20] sm:$0xff]  ;;  %v468_v39 = vld [vmem:[#allocation4 + $0x18] sm:$0xff] }
  0x14   :  { %v467_v40 = vld [vmem:[#allocation4 + $0x10] sm:$0xff]  ;;  %v490_v41 = vld [vmem:[%s636_s4] ss:$0 sm:$0xff]  ;;  %v466_v47 = vld [vmem:[#allocation4 + $0x8] sm:$0xff] }
  0x15   :  { %482 = vset.pattern.permute.xlu0 %v551_v6  ;;  %v465_v48 = vld [vmem:[#allocation4] sm:$0xff]  ;;  %484 = vset.pattern.permute.xlu1 %v552_v49 }
  0x16   :  { %74 = vperm.xlu0 %482, %v602_v2   ;;  %160 = vmatpush.bf16.msra.mxu0 %v454_v5  ;;  %v491_v50 = vld [vmem:[%s636_s4 + $0x1] ss:$0 sm:$0xff]  ;;  %v492_v56 = vld [vmem:[%s638_s6] ss:$0 sm:$0xff] }
  0x17   :  { %245 = vmatpush.bf16.msra.mxu1 %v462_v14  ;;  %327 = vmatpush.bf16.msra.mxu2 %v471_v36 }
  0x18   :  { %340 = vperm.xlu1 %484, %v602_v2  }
  0x1a   :  { %161 = vmatpush.bf16.msra.mxu0 %v453_v7 }
  0x1b   :  { %246 = vmatpush.bf16.msra.mxu1 %v461_v15  ;;  %328 = vmatpush.bf16.msra.mxu2 %v470_v37 }
  0x1e   :  { %162 = vmatpush.bf16.msra.mxu0 %v452_v8  ;;  %485 = vset.pattern.permute.xlu0 %v552_v49 }
  0x1f   :  { %247 = vmatpush.bf16.msra.mxu1 %v460_v18  ;;  %329 = vmatpush.bf16.msra.mxu2 %v469_v38 }
  0x22   :  { %163 = vmatpush.bf16.msra.mxu0 %v451_v9 }
  0x23   :  { %248 = vmatpush.bf16.msra.mxu1 %v459_v23  ;;  %330 = vmatpush.bf16.msra.mxu2 %v468_v39 }
  0x26   :  { %164 = vmatpush.bf16.msra.mxu0 %v450_v10 }
  0x27   :  { %249 = vmatpush.bf16.msra.mxu1 %v458_v33  ;;  %331 = vmatpush.bf16.msra.mxu2 %v467_v40 }
  0x2a   :  { %165 = vmatpush.bf16.msra.mxu0 %v449_v11 }
  0x2b   :  { %250 = vmatpush.bf16.msra.mxu1 %v457_v34  ;;  %332 = vmatpush.bf16.msra.mxu2 %v466_v47 }
  0x2f   :  { %333 = vmatpush.bf16.msra.mxu2 %v465_v48 }
  0x7f   :  { %v67_v16 = vpop.permute.xlu0 %66  ;;  %v83_v24 = vpop.permute.xlu1 %82 }
  0x80   :  { %v70_v20 = vmul.f32 %v487_v17, %v67_v16  ;;  %v86_v28 = vmul.f32 %v489_v22, %v83_v24 }
  0x82   :  { %v71_v26 = vadd.f32 %v486_v19, %v70_v20 }
  0x88   :  { %v75_v25 = vpop.permute.xlu0 %74 }
  0x89   :  { %v78_v27 = vmul.f32 %v488_v21, %v75_v25 }
  0x8a   :  { %v341_v58 = vpop.permute.xlu1 %340 }
  0x8b   :  { %v79_v29 = vadd.f32 %v78_v27, %v71_v26 }
  0x8d   :  { %v87_v30 = vadd.f32 %v86_v28, %v79_v29 }
  0x8f   :  { %v88_v31 = vmax.f32 %v87_v30, 0.0 }
  0x91   :  { %v89_v32 = vpack.c.bf16 %v88_v31, %v88_v31 }
  0x93   :  { %166 = vmatmul.bf16.vlgmr.msra.gmra.mxu0 %v89_v32 }
 0x110   :  { %v167_v42 = vpop.f32.mrf.mxu0 }
 0x111   :  { %v168_v43 = vadd.f32 %v490_v41, %v167_v42 }
 0x113   :  { %v171_v44 = vmax.f32 %v168_v43, 0.0 }
 0x115   :  { %v172_v45 = vpack.c.bf16 %v171_v44, %v171_v44 }
 0x117   :  { %251 = vmatmul.bf16.vlgmr.msra.gmra.mxu1 %v172_v45 }
 0x118   :  { %v169_v46 = vpop.f32.mrf.mxu0 }
 0x194   :  { %v252_v51 = vpop.f32.mrf.mxu1 }
 0x195   :  { %v253_v52 = vadd.f32 %v491_v50, %v252_v51 }
 0x197   :  { %v256_v53 = vmax.f32 %v253_v52, 0.0 }
 0x199   :  { %v257_v54 = vpack.c.bf16 %v256_v53, %v256_v53 }
 0x19b   :  { %334 = vmatmul.bf16.vlgmr.msra.gmra.mxu2 %v257_v54 }
 0x19c   :  { %v254_v55 = vpop.f32.mrf.mxu1 }
 0x21e   :  { %v335_v57 = vpop.f32.mrf.mxu2 }
 0x21f   :  { %v336_v59 = vadd.f32 %v492_v56, %v335_v57 }
 0x221   :  { %v343_v60 = vmul.f32 %v341_v58, %v336_v59 }
 0x223   :  { %345 = vst.msk [vmem:[%s639_s7] sm:$0xff] %vm344_vm0, %v343_v60 }
 0x226   :  { %v337_v61 = vpop.f32.mrf.mxu2 }
 0x227   :  { %350 = vsyncpa [#allocation3], 1 }
 0x228   :  { %351 = vsyncpa [#allocation5], 1 }

</bundles_post_ra>
